<compile_context>
chip_gen: v5e
topology: v5e:2x2
jax: 0.10.0
libtpu: 0.0.40
codegen_flags: <defaults>
</compile_context>

<pallas_src>
import functools
import math

import jax
import jax.numpy as jnp
from jax.experimental import pallas as pl
from jax.experimental.pallas import tpu as pltpu

MODEL_DIM = 40          # must be divisible by NHEAD
NHEAD = 10
HEAD_DIM = MODEL_DIM // NHEAD
UNFOLD = 3              # fixed local window: l-1, l, l+1


def _device_kind():
    try:
        return jax.devices()[0].device_kind.lower()
    except Exception:
        return ""


def _pick_config(batch):
    """(num_grid_steps, use_bf16_exp) per TPU generation."""
    kind = _device_kind()
    is_v7 = ("v7" in kind) or ("7x" in kind)
    use_bf16_exp = is_v7 or ("v6" in kind)     # v5e and older: keep f32 exp
    num_steps = 2 if (is_v7 and batch >= 2 and batch % 2 == 0) else 1
    return num_steps, use_bf16_exp


def msa1_kernel(x_ref, wqkv_ref, bqkv_ref, wo_ref, bo_ref, ggt_ref, o_ref, *,
                seq_len, use_bf16_exp):
    x = x_ref[0]                                   # (D, Lf) f32, lanes = B_fold*L
    D, Lf = x.shape

    # Fused Q/K/V projection: one (3D, D)bf16 @ (D, Lf)bf16 MXU pass, f32 acc.
    qkv = jnp.dot(wqkv_ref[...], x.astype(jnp.bfloat16),
                  preferred_element_type=jnp.float32) + bqkv_ref[...]
    q = qkv[0 * D:1 * D, :]
    k = qkv[1 * D:2 * D, :]
    v = qkv[2 * D:3 * D, :]

    # Zero-padded local window via XLU lane rotation + per-sequence boundary
    # masks.  (lane % seq_len) handles batch seams after the lane-axis fold,
    # matching F.unfold(kernel=(3,1), padding=(1,0)) semantics per sequence.
    lane = jax.lax.broadcasted_iota(jnp.int32, (D, Lf), 1)
    pos = lane % seq_len
    first_col = pos == 0
    last_col = pos == seq_len - 1
    k_prev = jnp.where(first_col, 0.0, pltpu.roll(k, shift=1, axis=1))
    k_next = jnp.where(last_col, 0.0, pltpu.roll(k, shift=Lf - 1, axis=1))
    v_prev = jnp.where(first_col, 0.0, pltpu.roll(v, shift=1, axis=1))
    v_next = jnp.where(last_col, 0.0, pltpu.roll(v, shift=Lf - 1, axis=1))

    # Per-head score reduce + broadcast for all 3 window positions in a single
    # bf16 MXU matmul.  ggt is the block-diagonal head mask with
    # 1/sqrt(head_dim) folded in at pack time.
    qk_all = jnp.concatenate([q * k_prev, q * k, q * k_next],
                             axis=1).astype(jnp.bfloat16)          # (D, 3*Lf)
    s_all = jnp.dot(ggt_ref[...], qk_all,
                    preferred_element_type=jnp.float32)            # (D, 3*Lf)
    s_prev = s_all[:, 0 * Lf:1 * Lf]
    s_cur = s_all[:, 1 * Lf:2 * Lf]
    s_next = s_all[:, 2 * Lf:3 * Lf]

    # Softmax over the 3 window positions (padded positions score 0, exactly
    # like the zero-padded unfold in PyTorch).
    m = jnp.maximum(jnp.maximum(s_prev, s_cur), s_next)
    if use_bf16_exp:
        # v6e/v7x: bf16 EUP halves exp slot pressure; accumulation stays f32.
        def ex(t):
            return jnp.exp(t.astype(jnp.bfloat16)).astype(jnp.float32)
    else:
        # v5e: no bf16 EUP/VPU path -- keep f32.
        def ex(t):
            return jnp.exp(t)
    e_prev = ex(s_prev - m)
    e_cur = ex(s_cur - m)
    e_next = ex(s_next - m)
    inv = pl.reciprocal(e_prev + e_cur + e_next, approx=True)

    # TODO(synk): nn.Dropout on the attention weights is treated as identity
    # (eval-mode semantics); no RNG dropout is applied here.
    att = (e_prev * v_prev + e_cur * v + e_next * v_next) * inv    # (D, Lf)

    ret = jnp.dot(wo_ref[...], att.astype(jnp.bfloat16),
                  preferred_element_type=jnp.float32) + bo_ref[...]
    o_ref[0] = ret


def msa1_forward(x_nchw, params):
    """x_nchw: (B, model_dim, L, 1) float32 -> (B, model_dim, L, 1) float32."""
    B, D, L, W = x_nchw.shape
    assert W == 1 and D == MODEL_DIM

    num_steps, use_bf16_exp = _pick_config(B)
    b_fold = B // num_steps
    Lf = b_fold * L

    # Lane-axis batch fold (wrapper-side layout plumbing, not compute):
    # (B, D, L) -> (num_steps, D, b_fold*L).
    x = x_nchw[..., 0]
    xf = (x.reshape(num_steps, b_fold, D, L)
            .transpose(0, 2, 1, 3)
            .reshape(num_steps, D, Lf))

    def rep(shape):
        return pl.BlockSpec(shape, lambda s, n=len(shape): (0,) * n)

    flops = 2 * B * L * D * D * 7                        # QKV(3) + scores(3) + WO(1)
    transcendentals = 4 * B * D * L                      # 3 exps + 1 reciprocal / elem
    bytes_accessed = (2 * B * D * L * 4                  # x in + out (f32)
                      + (3 * D * D + D * D + D * D) * 2  # bf16 W_qkv, WO, ggt
                      + (3 * D + D) * 4)                 # f32 biases

    kernel = functools.partial(msa1_kernel, seq_len=L, use_bf16_exp=use_bf16_exp)

    out = pl.pallas_call(
        kernel,
        out_shape=jax.ShapeDtypeStruct((num_steps, D, Lf), jnp.float32),
        grid=(num_steps,),
        in_specs=[pl.BlockSpec((1, D, Lf), lambda s: (s, 0, 0)),
                  rep((3 * D, D)), rep((3 * D, 1)),      # fused W_qkv (3D,D), bias (3D,1)
                  rep((D, D)), rep((D, 1)),              # WO, bo
                  rep((D, D))],                          # scaled block-diagonal GG^T
        out_specs=pl.BlockSpec((1, D, Lf), lambda s: (s, 0, 0)),
        compiler_params=pltpu.CompilerParams(dimension_semantics=("parallel",)),
        cost_estimate=pl.CostEstimate(flops=flops,
                                      transcendentals=transcendentals,
                                      bytes_accessed=bytes_accessed),
    )(xf, *params)

    # Undo the lane fold and restore NCHW.
    out = (out.reshape(num_steps, D, b_fold, L)
              .transpose(0, 2, 1, 3)
              .reshape(B, D, L))
    return out[..., None]


def init_params(key):
    """Deterministic init mimicking PyTorch Conv2d(1x1) default (U(-s, s), s=1/sqrt(in))."""
    D = MODEL_DIM
    ks = jax.random.split(key, 8)

    def conv_w(k):
        s = 1.0 / math.sqrt(D)
        return jax.random.uniform(k, (D, D), jnp.float32, -s, s)   # (out, in)

    def conv_b(k):
        s = 1.0 / math.sqrt(D)
        return jax.random.uniform(k, (D,), jnp.float32, -s, s)

    WQ, bq = conv_w(ks[0]), conv_b(ks[1])
    WK, bk = conv_w(ks[2]), conv_b(ks[3])
    WV, bv = conv_w(ks[4]), conv_b(ks[5])
    WO, bo = conv_w(ks[6]), conv_b(ks[7])
    return WQ, bq, WK, bk, WV, bv, WO, bo


def pack_params(WQ, bq, WK, bk, WV, bv, WO, bo):
    """Host-side packing: fuse QKV, precompute scaled block-diagonal GG^T, bf16 weights."""
    D = MODEL_DIM
    w_qkv = jnp.concatenate([WQ, WK, WV], axis=0).astype(jnp.bfloat16)   # (3D, D)
    b_qkv = jnp.concatenate([bq, bk, bv], axis=0)[:, None]               # (3D, 1) f32
    head_idx = jnp.arange(D) // HEAD_DIM
    ggt = (head_idx[:, None] == head_idx[None, :]).astype(jnp.float32)   # (D, D) 0/1
    # Fold 1/sqrt(head_dim) into ggt (0.5 for head_dim=4 -> exact in bf16).
    ggt_scaled = (ggt / math.sqrt(HEAD_DIM)).astype(jnp.bfloat16)
    return (w_qkv, b_qkv, WO.astype(jnp.bfloat16), bo[:, None], ggt_scaled)


def msa1_ref(x_nchw, WQ, bq, WK, bk, WV, bv, WO, bo):
    """Pure-JAX reference mirroring the PyTorch code exactly (ax=None, eval mode)."""
    B, D, L, _ = x_nchw.shape
    xc = x_nchw[..., 0]                            # (B, D, L)

    def proj(W, b):
        return jnp.einsum('od,bdl->bol', W, xc) + b[None, :, None]

    q, k, v = proj(WQ, bq), proj(WK, bk), proj(WV, bv)
    qh = q.reshape(B, NHEAD, HEAD_DIM, 1, L)

    def unfold(t):
        tp = jnp.pad(t, ((0, 0), (0, 0), (1, 1)))
        stk = jnp.stack([tp[:, :, u:u + L] for u in range(UNFOLD)], axis=2)
        return stk.reshape(B, NHEAD, HEAD_DIM, UNFOLD, L)

    kh, vh = unfold(k), unfold(v)
    scores = (qh * kh).sum(2, keepdims=True) / math.sqrt(HEAD_DIM)
    alphas = jax.nn.softmax(scores, axis=3)
    att = (alphas * vh).sum(3).reshape(B, NHEAD * HEAD_DIM, L)
    ret = jnp.einsum('od,bdl->bol', WO, att) + bo[None, :, None]
    return ret[..., None]


if __name__ == "__main__":
    key = jax.random.PRNGKey(0)
    kx, kp = jax.random.split(key)

    B, L = 2, 128            # L = 128 fills the 128-lane vreg axis; batch is lane-folded
    x = jax.random.normal(kx, (B, MODEL_DIM, L, 1), jnp.float32)

    raw = init_params(kp)
    params = pack_params(*raw)

    out = msa1_forward(x, params)
    out = jax.block_until_ready(out)

    ref = msa1_ref(x, *raw)
    assert out.shape == (B, MODEL_DIM, L, 1)
    max_err = jnp.max(jnp.abs(out - ref))
    # bf16 matmul operands (QKV / scores / WO), bf16 exp on v6e/v7x and the
    # EUP approximate reciprocal -> loosened tolerance vs a pure-f32 reference.
    assert jnp.allclose(out, ref, atol=3e-2, rtol=3e-2), f"max abs err {max_err}"

    print("KERNEL_OK")
</pallas_src>

<mosaic_0001>
module attributes {stable_mosaic.version = 11 : i64} {
  func.func @msa1_kernel(%arg0: i32, %arg1: memref<1x40x256xf32, #tpu.memory_space<vmem>>, %arg2: memref<120x40xbf16, #tpu.memory_space<vmem>>, %arg3: memref<120x1xf32, #tpu.memory_space<vmem>>, %arg4: memref<40x40xbf16, #tpu.memory_space<vmem>>, %arg5: memref<40x1xf32, #tpu.memory_space<vmem>>, %arg6: memref<40x40xbf16, #tpu.memory_space<vmem>>, %arg7: memref<1x40x256xf32, #tpu.memory_space<vmem>>) attributes {dimension_semantics = [#tpu.dimension_semantics<parallel>], iteration_bounds = array<i64: 1>, scalar_prefetch = 0 : i64, scratch_operands = 0 : i64, tpu.core_type = #tpu.core_type<tc>, window_params = [{transform_indices = @transform_0, window_bounds = array<i64: 1, 40, 256>}, {pipeline_mode = #tpu.pipeline_mode<synchronous>, transform_indices = @transform_1, window_bounds = array<i64: 120, 40>}, {pipeline_mode = #tpu.pipeline_mode<synchronous>, transform_indices = @transform_2, window_bounds = array<i64: 120, 1>}, {pipeline_mode = #tpu.pipeline_mode<synchronous>, transform_indices = @transform_3, window_bounds = array<i64: 40, 40>}, {pipeline_mode = #tpu.pipeline_mode<synchronous>, transform_indices = @transform_4, window_bounds = array<i64: 40, 1>}, {pipeline_mode = #tpu.pipeline_mode<synchronous>, transform_indices = @transform_5, window_bounds = array<i64: 40, 40>}, {transform_indices = @transform_6, window_bounds = array<i64: 1, 40, 256>}]} {
    %c0 = arith.constant 0 : index
    %c0_0 = arith.constant 0 : index
    %c0_1 = arith.constant 0 : index
    %0 = vector.load %arg1[%c0, %c0_0, %c0_1] : memref<1x40x256xf32, #tpu.memory_space<vmem>>, vector<1x40x256xf32>
    %1 = vector.shape_cast %0 : vector<1x40x256xf32> to vector<40x256xf32>
    %c0_2 = arith.constant 0 : index
    %c0_3 = arith.constant 0 : index
    %2 = vector.load %arg2[%c0_2, %c0_3] : memref<120x40xbf16, #tpu.memory_space<vmem>>, vector<120x40xbf16>
    %3 = arith.truncf %1 : vector<40x256xf32> to vector<40x256xbf16>
    %cst = arith.constant dense<0.000000e+00> : vector<120x256xf32>
    %4 = tpu.matmul %2, %3, %cst {dimension_numbers = #tpu.dot_dimension_numbers<[1], [0], [0], [1], [0, 0, 1, 1], [], []>} : vector<120x40xbf16>, vector<40x256xbf16>, vector<120x256xf32> -> vector<120x256xf32>
    %c0_4 = arith.constant 0 : index
    %c0_5 = arith.constant 0 : index
    %5 = vector.load %arg3[%c0_4, %c0_5] : memref<120x1xf32, #tpu.memory_space<vmem>>, vector<120x1xf32>
    %6 = vector.broadcast %5 : vector<120x1xf32> to vector<120x256xf32>
    %7 = arith.addf %4, %6 : vector<120x256xf32>
    %8 = vector.extract_strided_slice %7 {offsets = [0, 0], sizes = [40, 256], strides = [1, 1]} : vector<120x256xf32> to vector<40x256xf32>
    %9 = vector.extract_strided_slice %7 {offsets = [40, 0], sizes = [40, 256], strides = [1, 1]} : vector<120x256xf32> to vector<40x256xf32>
    %10 = vector.extract_strided_slice %7 {offsets = [80, 0], sizes = [40, 256], strides = [1, 1]} : vector<120x256xf32> to vector<40x256xf32>
    %11 = tpu.iota {dimensions = array<i32: 1>} : vector<40x256xi32>
    %c128_i32 = arith.constant 128 : i32
    %c0_i32 = arith.constant 0 : i32
    %12 = arith.cmpi eq, %c128_i32, %c0_i32 : i32
    %c1_i32 = arith.constant 1 : i32
    %13 = arith.select %12, %c1_i32, %c128_i32 : i32
    %14 = vector.broadcast %13 : i32 to vector<40x256xi32>
    %15 = arith.remsi %11, %14 : vector<40x256xi32>
    %c0_i32_6 = arith.constant 0 : i32
    %16 = vector.broadcast %c0_i32_6 : i32 to vector<40x256xi32>
    %17 = arith.cmpi ne, %15, %16 : vector<40x256xi32>
    %c0_i32_7 = arith.constant 0 : i32
    %18 = vector.broadcast %c0_i32_7 : i32 to vector<40x256xi32>
    %19 = arith.cmpi slt, %15, %18 : vector<40x256xi32>
    %c0_i32_8 = arith.constant 0 : i32
    %20 = arith.cmpi slt, %13, %c0_i32_8 : i32
    %21 = vector.broadcast %20 : i1 to vector<40x256xi1>
    %22 = vector.broadcast %21 : vector<40x256xi1> to vector<40x256xi1>
    %23 = arith.xori %19, %22 : vector<40x256xi1>
    %24 = arith.andi %23, %17 : vector<40x256xi1>
    %25 = vector.broadcast %13 : i32 to vector<40x256xi32>
    %26 = arith.addi %15, %25 : vector<40x256xi32>
    %27 = arith.select %24, %26, %15 : vector<40x256xi1>, vector<40x256xi32>
    %c0_i32_9 = arith.constant 0 : i32
    %28 = vector.broadcast %c0_i32_9 : i32 to vector<40x256xi32>
    %29 = arith.cmpi eq, %27, %28 : vector<40x256xi32>
    %c127_i32 = arith.constant 127 : i32
    %30 = vector.broadcast %c127_i32 : i32 to vector<40x256xi32>
    %31 = arith.cmpi eq, %27, %30 : vector<40x256xi32>
    %c1_i32_10 = arith.constant 1 : i32
    %32 = tpu.dynamic_rotate %9 by %c1_i32_10 dim 1 : vector<40x256xf32>, i32 -> vector<40x256xf32>
    %cst_11 = arith.constant 0.000000e+00 : f32
    %33 = vector.broadcast %cst_11 : f32 to vector<40x256xf32>
    %34 = arith.select %29, %33, %32 : vector<40x256xi1>, vector<40x256xf32>
    %c255_i32 = arith.constant 255 : i32
    %35 = tpu.dynamic_rotate %9 by %c255_i32 dim 1 : vector<40x256xf32>, i32 -> vector<40x256xf32>
    %cst_12 = arith.constant 0.000000e+00 : f32
    %36 = vector.broadcast %cst_12 : f32 to vector<40x256xf32>
    %37 = arith.select %31, %36, %35 : vector<40x256xi1>, vector<40x256xf32>
    %c1_i32_13 = arith.constant 1 : i32
    %38 = tpu.dynamic_rotate %10 by %c1_i32_13 dim 1 : vector<40x256xf32>, i32 -> vector<40x256xf32>
    %cst_14 = arith.constant 0.000000e+00 : f32
    %39 = vector.broadcast %cst_14 : f32 to vector<40x256xf32>
    %40 = arith.select %29, %39, %38 : vector<40x256xi1>, vector<40x256xf32>
    %c255_i32_15 = arith.constant 255 : i32
    %41 = tpu.dynamic_rotate %10 by %c255_i32_15 dim 1 : vector<40x256xf32>, i32 -> vector<40x256xf32>
    %cst_16 = arith.constant 0.000000e+00 : f32
    %42 = vector.broadcast %cst_16 : f32 to vector<40x256xf32>
    %43 = arith.select %31, %42, %41 : vector<40x256xi1>, vector<40x256xf32>
    %44 = arith.mulf %8, %34 : vector<40x256xf32>
    %45 = arith.mulf %8, %9 : vector<40x256xf32>
    %46 = arith.mulf %8, %37 : vector<40x256xf32>
    %47 = tpu.concatenate %44, %45, %46 in 1 : vector<40x256xf32>, vector<40x256xf32>, vector<40x256xf32> -> vector<40x768xf32>
    %48 = arith.truncf %47 : vector<40x768xf32> to vector<40x768xbf16>
    %c0_17 = arith.constant 0 : index
    %c0_18 = arith.constant 0 : index
    %49 = vector.load %arg6[%c0_17, %c0_18] : memref<40x40xbf16, #tpu.memory_space<vmem>>, vector<40x40xbf16>
    %cst_19 = arith.constant dense<0.000000e+00> : vector<40x768xf32>
    %50 = tpu.matmul %49, %48, %cst_19 {dimension_numbers = #tpu.dot_dimension_numbers<[1], [0], [0], [1], [0, 0, 1, 1], [], []>} : vector<40x40xbf16>, vector<40x768xbf16>, vector<40x768xf32> -> vector<40x768xf32>
    %51 = vector.extract_strided_slice %50 {offsets = [0, 0], sizes = [40, 256], strides = [1, 1]} : vector<40x768xf32> to vector<40x256xf32>
    %52 = vector.extract_strided_slice %50 {offsets = [0, 256], sizes = [40, 256], strides = [1, 1]} : vector<40x768xf32> to vector<40x256xf32>
    %53 = vector.extract_strided_slice %50 {offsets = [0, 512], sizes = [40, 256], strides = [1, 1]} : vector<40x768xf32> to vector<40x256xf32>
    %54 = arith.maximumf %51, %52 : vector<40x256xf32>
    %55 = arith.maximumf %54, %53 : vector<40x256xf32>
    %56 = arith.subf %51, %55 : vector<40x256xf32>
    %57 = math.exp %56 : vector<40x256xf32>
    %58 = arith.subf %52, %55 : vector<40x256xf32>
    %59 = math.exp %58 : vector<40x256xf32>
    %60 = arith.subf %53, %55 : vector<40x256xf32>
    %61 = math.exp %60 : vector<40x256xf32>
    %62 = arith.addf %57, %59 : vector<40x256xf32>
    %63 = arith.addf %62, %61 : vector<40x256xf32>
    %64 = tpu.reciprocal %63 {approx = true} : vector<40x256xf32> -> vector<40x256xf32>
    %65 = arith.mulf %57, %40 : vector<40x256xf32>
    %66 = arith.mulf %59, %10 : vector<40x256xf32>
    %67 = arith.addf %65, %66 : vector<40x256xf32>
    %68 = arith.mulf %61, %43 : vector<40x256xf32>
    %69 = arith.addf %67, %68 : vector<40x256xf32>
    %70 = arith.mulf %69, %64 : vector<40x256xf32>
    %c0_20 = arith.constant 0 : index
    %c0_21 = arith.constant 0 : index
    %71 = vector.load %arg4[%c0_20, %c0_21] : memref<40x40xbf16, #tpu.memory_space<vmem>>, vector<40x40xbf16>
    %72 = arith.truncf %70 : vector<40x256xf32> to vector<40x256xbf16>
    %cst_22 = arith.constant dense<0.000000e+00> : vector<40x256xf32>
    %73 = tpu.matmul %71, %72, %cst_22 {dimension_numbers = #tpu.dot_dimension_numbers<[1], [0], [0], [1], [0, 0, 1, 1], [], []>} : vector<40x40xbf16>, vector<40x256xbf16>, vector<40x256xf32> -> vector<40x256xf32>
    %c0_23 = arith.constant 0 : index
    %c0_24 = arith.constant 0 : index
    %74 = vector.load %arg5[%c0_23, %c0_24] : memref<40x1xf32, #tpu.memory_space<vmem>>, vector<40x1xf32>
    %75 = vector.broadcast %74 : vector<40x1xf32> to vector<40x256xf32>
    %76 = arith.addf %73, %75 : vector<40x256xf32>
    %c0_25 = arith.constant 0 : index
    %c0_26 = arith.constant 0 : index
    %c0_27 = arith.constant 0 : index
    %77 = vector.load %arg7[%c0_25, %c0_26, %c0_27] : memref<1x40x256xf32, #tpu.memory_space<vmem>>, vector<1x40x256xf32>
    %78 = vector.shape_cast %77 : vector<1x40x256xf32> to vector<40x256xf32>
    %79 = vector.shape_cast %76 : vector<40x256xf32> to vector<1x40x256xf32>
    tpu.vector_store %arg7[%c0_25, %c0_26, %c0_27], %79 {strides = array<i32>} : memref<1x40x256xf32, #tpu.memory_space<vmem>>, vector<1x40x256xf32>,
    return
  }
  func.func @transform_0(%arg0: i32) -> (i32, i32, i32) {
    %c0_i32 = arith.constant 0 : i32
    %c0_i32_0 = arith.constant 0 : i32
    %c0_i32_1 = arith.constant 0 : i32
    return %arg0, %c0_i32, %c0_i32_0 : i32, i32, i32
  }
  func.func @transform_1(%arg0: i32) -> (i32, i32) {
    %c0_i32 = arith.constant 0 : i32
    %c0_i32_0 = arith.constant 0 : i32
    %c0_i32_1 = arith.constant 0 : i32
    return %c0_i32, %c0_i32_0 : i32, i32
  }
  func.func @transform_2(%arg0: i32) -> (i32, i32) {
    %c0_i32 = arith.constant 0 : i32
    %c0_i32_0 = arith.constant 0 : i32
    %c0_i32_1 = arith.constant 0 : i32
    return %c0_i32, %c0_i32_0 : i32, i32
  }
  func.func @transform_3(%arg0: i32) -> (i32, i32) {
    %c0_i32 = arith.constant 0 : i32
    %c0_i32_0 = arith.constant 0 : i32
    %c0_i32_1 = arith.constant 0 : i32
    return %c0_i32, %c0_i32_0 : i32, i32
  }
  func.func @transform_4(%arg0: i32) -> (i32, i32) {
    %c0_i32 = arith.constant 0 : i32
    %c0_i32_0 = arith.constant 0 : i32
    %c0_i32_1 = arith.constant 0 : i32
    return %c0_i32, %c0_i32_0 : i32, i32
  }
  func.func @transform_5(%arg0: i32) -> (i32, i32) {
    %c0_i32 = arith.constant 0 : i32
    %c0_i32_0 = arith.constant 0 : i32
    %c0_i32_1 = arith.constant 0 : i32
    return %c0_i32, %c0_i32_0 : i32, i32
  }
  func.func @transform_6(%arg0: i32) -> (i32, i32, i32) {
    %c0_i32 = arith.constant 0 : i32
    %c0_i32_0 = arith.constant 0 : i32
    %c0_i32_1 = arith.constant 0 : i32
    return %arg0, %c0_i32, %c0_i32_0 : i32, i32, i32
  }
}

</mosaic_0001>

<bundles_post_ra>
// kernel: tpu_custom_call.1
= control target key start
LH: loop header
LB: loop body
LE: loop exit
PB: predicated region body
PF: predicated region fallthrough
CT: control target
= control target key end

     0   :  { %vm209_vm0 = vcmask 1043456   ;;  %v1295_v8 = vmov 0   ;;  %s2162_s0 = inlined_call_operand.vmem [shape: f32[1,40,256], index: 0, kind: input, shape index: {}]   ;;  %s2163_s1 = inlined_call_operand.vmem [shape: bf16[120,40], index: 1, kind: input, shape index: {}]   ;;  %s2164_s2 = inlined_call_operand.vmem [shape: f32[120,1], index: 2, kind: input, shape index: {}]   ;;  %s2165_s3 = inlined_call_operand.vmem [shape: bf16[40,40], index: 3, kind: input, shape index: {}]   ;;  %s2166_s4 = inlined_call_operand.vmem [shape: f32[40,1], index: 4, kind: input, shape index: {}]   ;;  %s2167_s5 = inlined_call_operand.vmem [shape: bf16[40,40], index: 5, kind: input, shape index: {}]   ;;  %s2168_s6 = inlined_call_operand.hbm [shape: f32[1,40,256], index: 6, kind: output, shape index: {}]  }
   0x1   :  { %v33_v0 = vld [vmem:[%s2162_s0 + $0x40] sm:$0xff]  ;;  %v34_v1 = vld [vmem:[%s2162_s0 + $0x48] sm:$0xff]  ;;  %v31_v5 = vld [vmem:[%s2162_s0 + $0x30] sm:$0xff]  ;;  %1188 = vset.pattern.permute.xlu2 %v1295_v8  ;;  %1186 = vset.pattern.permute.xlu0 %v1295_v8 }
   0x2   :  { %v29_v2 = vld [vmem:[%s2162_s0 + $0x20] sm:$0xff]  ;;  %v54_v3 = vpack.c.bf16 %v33_v0, %v33_v0  ;;  %v55_v4 = vpack.c.bf16 %v34_v1, %v34_v1  ;;  %v30_v6 = vld [vmem:[%s2162_s0 + $0x28] sm:$0xff]  ;;  %v32_v7 = vld [vmem:[%s2162_s0 + $0x38] sm:$0xff]  ;;  %1187 = vset.pattern.permute.xlu1 %v1295_v8 }
   0x3   :  { %v62_v11 = vld [vmem:[%s2164_s2 + $0x30] sm:$0xff]  ;;  %v52_v12 = vpack.c.bf16 %v31_v5, %v29_v2  ;;  %v53_v13 = vpack.c.bf16 %v32_v7, %v30_v6  ;;  %v25_v14 = vld [vmem:[%s2162_s0] sm:$0xff]  ;;  %v65_v15 = vld [vmem:[%s2164_s2 + $0x48] sm:$0xff] }
   0x4   :  { %v211_v9 = vsel %vm209_vm0, %v54_v3, 0  ;;  %v214_v10 = vsel %vm209_vm0, %v55_v4, 0  ;;  %v27_v16 = vld [vmem:[%s2162_s0 + $0x10] sm:$0xff]  ;;  %v26_v17 = vld [vmem:[%s2162_s0 + $0x8] sm:$0xff]  ;;  %v28_v18 = vld [vmem:[%s2162_s0 + $0x18] sm:$0xff]  ;;  %103 = vperm.xlu2 %1188, %v62_v11   ;;  %118 = vperm.xlu0 %1186, %v65_v15  }
   0x5   :  { %221 = vmatpush.bf16.msra.mxu0 %v211_v9  ;;  %269 = vmatpush.bf16.msra.mxu1 %v214_v10 }
   0x6   :  { %1174 = vmatpush.bf16.msra.mxu2 %v211_v9  ;;  %1177 = vmatpush.bf16.msra.mxu3 %v214_v10 }
   0x7   :  { %11 = vsyncpa [#allocation3], 0  ;;  %v50_v19 = vpack.c.bf16 %v27_v16, %v25_v14  ;;  %v51_v20 = vpack.c.bf16 %v28_v18, %v26_v17  ;;  %v60_v21 = vld [vmem:[%s2164_s2 + $0x20] sm:$0xff]  ;;  %v63_v22 = vld [vmem:[%s2164_s2 + $0x38] sm:$0xff]  ;;  %vm184_vm1 = vcmask 326656   ;;  %s1296_s24 = smov 1  }
   0x8   :  { %v1163_v23 = vld [vmem:[%s2163_s1] sm:$0xff]  ;;  %v58_v25 = vld [vmem:[%s2164_s2 + $0x10] sm:$0xff]  ;;  %v59_v26 = vld [vmem:[%s2164_s2 + $0x18] sm:$0xff]  ;;  %s1297_s27 = smov 127   ;;  %s1067_s10 = sshll.u32 %s2168_s6, 4  ;;  %s1068_s10 = int_to_ptr.hbm [resolvable:$true] %s1067_s10 }
   0x9   :  { %222 = vmatpush.bf16.msra.mxu0 %v52_v12  ;;  %270 = vmatpush.bf16.msra.mxu1 %v53_v13  ;;  %v64_v24 = vld [vmem:[%s2164_s2 + $0x40] sm:$0xff]  ;;  %v1164_v28 = vld [vmem:[%s2163_s1 + $0x8] sm:$0xff]  ;;  %v1165_v30 = vld [vmem:[%s2163_s1 + $0x10] sm:$0xff]  ;;  %s1299_s11 = smov 256   ;;  %s1300_s12 = smov 16  }
   0xa   :  { %1175 = vmatpush.bf16.msra.mxu2 %v52_v12  ;;  %1178 = vmatpush.bf16.msra.mxu3 %v53_v13  ;;  %v56_v27 = vld [vmem:[%s2164_s2] sm:$0xff]  ;;  %v61_v29 = vld [vmem:[%s2164_s2 + $0x28] sm:$0xff]  ;;  %v1166_v31 = vld [vmem:[%s2163_s1 + $0x18] sm:$0xff] }
   0xb   :  { %113 = vperm.xlu1 %1187, %v64_v24   ;;  %v1167_v32 = vld [vmem:[%s2163_s1 + $0x20] sm:$0xff]  ;;  %v1168_v41 = vld [vmem:[%s2163_s1 + $0x28] sm:$0xff]  ;;  %v1169_v50 = vld [vmem:[%s2163_s1 + $0x30] sm:$0xff] }
   0xc   :  { %93 = vperm.xlu2 %1188, %v60_v21   ;;  %108 = vperm.xlu0 %1186, %v63_v22   ;;  %v49_v13 = vld [vmem:[%s2163_s1 + $0x38] sm:$0xf] }
   0xd   :  { %223 = vmatpush.bf16.msra.mxu0 %v50_v19  ;;  %271 = vmatpush.bf16.msra.mxu1 %v51_v20  ;;  %v175_v14 = vunpack.c.l.b16 %v49_v13 }
   0xe   :  { %1176 = vmatpush.bf16.msra.mxu2 %v50_v19  ;;  %1179 = vmatpush.bf16.msra.mxu3 %v51_v20 }
   0xf   :  { %v183_v17 = vpack.c.b16 %v175_v14, %v175_v14 }
  0x10   :  { %1107 = vmatmul.msk.bf16.vlgmr.msra.gmra.mxu0 %vm184_vm1, %v1163_v23  ;;  %1115 = vmatmul.msk.bf16.vlgmr.msra.gmra.mxu1 %vm184_vm1, %v1163_v23 }
  0x11   :  { %1114 = vmatmul.msk.bf16.vlgmr.msra.gmra.mxu2 %vm184_vm1, %v183_v17  ;;  %1122 = vmatmul.msk.bf16.vlgmr.msra.gmra.mxu3 %vm184_vm1, %v183_v17 }
  0x13   :  { %98 = vperm.xlu1 %1187, %v61_v29  }
  0x14   :  { %83 = vperm.xlu2 %1188, %v58_v25   ;;  %88 = vperm.xlu0 %1186, %v59_v26  }
  0x1c   :  { %73 = vperm.xlu2 %1188, %v56_v27   ;;  %v57_v27 = vld [vmem:[%s2164_s2 + $0x8] sm:$0xff] }
  0x20   :  { %1108 = vmatmul.msk.bf16.gmra.mxu0 %vm184_vm1, %v1164_v28  ;;  %1116 = vmatmul.msk.bf16.gmra.mxu1 %vm184_vm1, %v1164_v28 }
  0x30   :  { %1109 = vmatmul.msk.bf16.gmra.mxu0 %vm184_vm1, %v1165_v30  ;;  %1117 = vmatmul.msk.bf16.gmra.mxu1 %vm184_vm1, %v1165_v30  ;;  %v69_v30 = vld [vmem:[%s2164_s2 + $0x68] sm:$0xff] }
  0x40   :  { %1110 = vmatmul.msk.bf16.gmra.mxu0 %vm184_vm1, %v1166_v31  ;;  %1118 = vmatmul.msk.bf16.gmra.mxu1 %vm184_vm1, %v1166_v31  ;;  %v70_v31 = vld [vmem:[%s2164_s2 + $0x70] sm:$0xff] }
  0x50   :  { %1111 = vmatmul.msk.bf16.gmra.mxu0 %vm184_vm1, %v1167_v32  ;;  %1119 = vmatmul.msk.bf16.gmra.mxu1 %vm184_vm1, %v1167_v32  ;;  %v68_v32 = vld [vmem:[%s2164_s2 + $0x60] sm:$0xff] }
  0x5e   :  { %v1422_v35 = vpop.permute.xlu2 %103 }
  0x60   :  { %1112 = vmatmul.msk.bf16.gmra.mxu0 %vm184_vm1, %v1168_v41  ;;  %1120 = vmatmul.msk.bf16.gmra.mxu1 %vm184_vm1, %v1168_v41 }
  0x66   :  { %v94_v40 = vpop.permute.xlu2 %93 }
  0x6e   :  { %v84_v44 = vpop.permute.xlu2 %83 }
  0x70   :  { %1113 = vmatmul.msk.bf16.gmra.mxu0 %vm184_vm1, %v1169_v50  ;;  %1121 = vmatmul.msk.bf16.gmra.mxu1 %vm184_vm1, %v1169_v50 }
  0x76   :  { %v1433_v48 = vpop.permute.xlu2 %73  ;;  %v119_v55 = vpop.permute.xlu0 %118 }
  0x7d   :  { %v114_v45 = vpop.permute.xlu1 %113 }
  0x7e   :  { %v109_v59 = vpop.permute.xlu0 %108 }
  0x85   :  { %v99_v49 = vpop.permute.xlu1 %98 }
  0x86   :  { %v89_v4 = vpop.permute.xlu0 %88 }
  0x8d   :  { %v225_v33 = vpop.f32.mrf.mxu0  ;;  %v1420_v34 = vpop.f32.mrf.mxu1 }
  0x8e   :  { %v1441_v53 = vadd.f32 %v225_v33, %v1433_v48  ;;  %v66_v33 = vld [vmem:[%s2164_s2 + $0x50] sm:$0xff] }
  0x95   :  { %v1424_v36 = vpop.f32.mrf.mxu0  ;;  %v1426_v37 = vpop.f32.mrf.mxu1 }
  0x9d   :  { %v230_v38 = vpop.f32.mrf.mxu0  ;;  %v278_v39 = vpop.f32.mrf.mxu1 }
  0x9e   :  { %v1446_v62 = vadd.f32 %v230_v38, %v84_v44  ;;  %v1448_v63 = vadd.f32 %v278_v39, %v84_v44  ;;  %v312_v38 = vlaneseq }
  0xa0   :  { %v1537_v39 = vand.u32 127, %v312_v38  ;;  %v1591_v38 = vadd.f32 %v1420_v34, %v1433_v48 }
  0xa2   :  { %vm363_vm2 = vcmp.lt.s32.totalorder %v1537_v39, 1  ;;  %vm339_vm3 = vcmp.eq.s32.totalorder %v1537_v39, 0  ;;  %vm404_vm5 = vcmp.lt.s32.totalorder %v1537_v39, 127  ;;  %vm341_vm6 = vcmp.eq.s32.totalorder %v1537_v39, 127 }
  0xa5   :  { %v232_v42 = vpop.f32.mrf.mxu0  ;;  %v280_v43 = vpop.f32.mrf.mxu1 }
  0xa6   :  { %v1458_v7 = vadd.f32 %v232_v42, %v89_v4  ;;  %v1460_v8 = vadd.f32 %v280_v43, %v89_v4 }
  0xad   :  { %v235_v46 = vpop.f32.mrf.mxu0  ;;  %v283_v47 = vpop.f32.mrf.mxu1 }
  0xae   :  { %v1477_v18 = vadd.f32 %v235_v46, %v94_v40  ;;  %v1479_v21 = vadd.f32 %v283_v47, %v94_v40  ;;  %v1540_v40 = vadd.s32 128, %v1537_v39 }
  0xb0   :  { %v326_v42 = vand.u32 127, %v1540_v40 }
  0xb2   :  { %vm1547_vm4 = vcmp.eq.s32.totalorder %v326_v42, 0  ;;  %vm1627_vm7 = vcmp.eq.s32.totalorder %v326_v42, 127 }
  0xb5   :  { %v237_v51 = vpop.f32.mrf.mxu0  ;;  %v285_v52 = vpop.f32.mrf.mxu1 }
  0xb6   :  { %v238_v54 = vadd.f32 %v237_v51, %v99_v49  ;;  %v1501_v28 = vadd.f32 %v285_v52, %v99_v49 }
  0xb8   :  { %v1444_v56 = vmul.f32 %v238_v54, %v1441_v53 }
  0xbd   :  { %v240_v57 = vpop.f32.mrf.mxu0  ;;  %v288_v58 = vpop.f32.mrf.mxu1 }
  0xbe   :  { %v1484_v24 = vadd.f32 %v240_v57, %v1422_v35  ;;  %v1504_v29 = vadd.f32 %v288_v58, %v1422_v35  ;;  %v67_v35 = vld [vmem:[%s2164_s2 + $0x58] sm:$0xff] }
  0xc5   :  { %v242_v60 = vpop.f32.mrf.mxu0  ;;  %v290_v61 = vpop.f32.mrf.mxu1 }
  0xc6   :  { %v243_v0 = vadd.f32 %v242_v60, %v109_v59  ;;  %v291_v1 = vadd.f32 %v290_v61, %v109_v59 }
  0xc8   :  { %v1451_v2 = vmul.f32 %v243_v0, %v1446_v62  ;;  %v1454_v3 = vmul.f32 %v291_v1, %v1448_v63  ;;  %357 = vrot.lane.b32.xlu0 %v291_v1, %s1296_s24  ;;  %347 = vrot.lane.b32.xlu1 %v243_v0, %s1296_s24 }
  0xcd   :  { %v245_v5 = vpop.f32.mrf.mxu0  ;;  %v293_v6 = vpop.f32.mrf.mxu1 }
  0xce   :  { %v246_v9 = vadd.f32 %v245_v5, %v114_v45  ;;  %v294_v10 = vadd.f32 %v293_v6, %v114_v45 }
  0xd0   :  { %v1463_v11 = vmul.f32 %v246_v9, %v1458_v7  ;;  %v1466_v12 = vmul.f32 %v294_v10, %v1460_v8  ;;  %349 = vrot.lane.b32.xlu2 %v246_v9, %s1296_s24  ;;  %359 = vrot.lane.b32.xlu1 %v294_v10, %s1296_s24 }
  0xd2   :  { %v543_v15 = vpack.c.bf16 %v1463_v11, %v1451_v2  ;;  %v544_v16 = vpack.c.bf16 %v1466_v12, %v1454_v3 }
  0xd5   :  { %v247_v19 = vpop.f32.mrf.mxu0  ;;  %v295_v20 = vpop.f32.mrf.mxu1 }
  0xd6   :  { %v248_v22 = vadd.f32 %v247_v19, %v119_v55  ;;  %v296_v23 = vadd.f32 %v295_v20, %v119_v55 }
  0xd8   :  { %v1487_v25 = vmul.f32 %v248_v22, %v1477_v18  ;;  %v1490_v26 = vmul.f32 %v296_v23, %v1479_v21  ;;  %351 = vrot.lane.b32.xlu0 %v248_v22, %s1296_s24  ;;  %361 = vrot.lane.b32.xlu1 %v296_v23, %s1296_s24 }
  0xd9   :  { %345 = vrot.lane.b32.xlu2 %v1484_v24, %s1296_s24 }
  0xe0   :  { %78 = vperm.xlu0 %1186, %v57_v27   ;;  %343 = vrot.lane.b32.xlu1 %v238_v54, %s1296_s24 }
  0xe1   :  { %390 = vrot.lane.b32.xlu2 %v246_v9, %s1297_s27 }
  0xe8   :  { %353 = vrot.lane.b32.xlu0 %v1501_v28, %s1296_s24  ;;  %355 = vrot.lane.b32.xlu1 %v1504_v29, %s1296_s24 }
  0xe9   :  { %392 = vrot.lane.b32.xlu2 %v248_v22, %s1297_s27 }
  0xf0   :  { %402 = vrot.lane.b32.xlu0 %v296_v23, %s1297_s27  ;;  %388 = vrot.lane.b32.xlu1 %v243_v0, %s1297_s27 }
  0xf1   :  { %384 = vrot.lane.b32.xlu2 %v238_v54, %s1297_s27 }
  0xf8   :  { %398 = vrot.lane.b32.xlu0 %v291_v1, %s1297_s27  ;;  %400 = vrot.lane.b32.xlu1 %v294_v10, %s1297_s27 }
  0xf9   :  { %396 = vrot.lane.b32.xlu2 %v1504_v29, %s1297_s27 }
 0x100   :  { %386 = vrot.lane.b32.xlu0 %v1484_v24, %s1297_s27  ;;  %394 = vrot.lane.b32.xlu1 %v1501_v28, %s1297_s27 }
 0x101   :  { %138 = vperm.xlu2 %1188, %v69_v30  }
 0x108   :  { %143 = vperm.xlu0 %1186, %v70_v31   ;;  %133 = vperm.xlu1 %1187, %v68_v32  }
 0x110   :  { %123 = vperm.xlu0 %1186, %v66_v33   ;;  %128 = vperm.xlu1 %1187, %v67_v35   ;;  %v1585_v33 = vpop.f32.mrf.mxu2  ;;  %v1587_v35 = vpop.f32.mrf.mxu3 }
 0x12a   :  { %v350_v44 = vpop.permute.xlu2 %349 }
 0x133   :  { %v346_v4 = vpop.permute.xlu2 %345 }
 0x13a   :  { %v348_v41 = vpop.permute.xlu1 %347  ;;  %v358_v43 = vpop.permute.xlu0 %357 }
 0x13b   :  { %v366_v46 = vsel %vm363_vm2, %v348_v41, %v358_v43  ;;  %v371_v47 = vsel %vm363_vm2, %v358_v43, %v348_v41  ;;  %v1583_v32 = vpop.permute.xlu2 %390 }
 0x13c   :  { %v378_v49 = vsel %vm339_vm3, 0.0, %v371_v47  ;;  %v379_v50 = vsel %vm1547_vm4, 0.0, %v366_v46 }
 0x13d   :  { %v509_v58 = vmul.f32 %v378_v49, %v1446_v62  ;;  %v510_v60 = vmul.f32 %v379_v50, %v1448_v63 }
 0x142   :  { %v360_v51 = vpop.permute.xlu1 %359 }
 0x143   :  { %v367_v52 = vsel %vm363_vm2, %v350_v44, %v360_v51  ;;  %v372_v54 = vsel %vm363_vm2, %v360_v51, %v350_v44 }
 0x144   :  { %v380_v55 = vsel %vm339_vm3, 0.0, %v372_v54  ;;  %v381_v57 = vsel %vm1547_vm4, 0.0, %v367_v52  ;;  %v393_v52 = vpop.permute.xlu2 %392 }
 0x145   :  { %v511_v59 = vmul.f32 %v380_v55, %v1458_v7  ;;  %v512_v61 = vmul.f32 %v381_v57, %v1460_v8 }
 0x147   :  { %v541_v0 = vpack.c.bf16 %v511_v59, %v509_v58  ;;  %v542_v1 = vpack.c.bf16 %v512_v61, %v510_v60  ;;  %v550_v59 = vpack.c.bf16 %v1490_v26, %v1490_v26  ;;  %v549_v60 = vpack.c.bf16 %v1487_v25, %v1487_v25  ;;  %v262_v26 = vpop.f32.mrf.mxu2 }
 0x14a   :  { %v352_v5 = vpop.permute.xlu0 %351  ;;  %v362_v6 = vpop.permute.xlu1 %361 }
 0x14b   :  { %v368_v9 = vsel %vm363_vm2, %v352_v5, %v362_v6  ;;  %v373_v10 = vsel %vm363_vm2, %v362_v6, %v352_v5  ;;  %v310_v5 = vpop.f32.mrf.mxu3  ;;  %v590_v6 = vsel %vm209_vm0, %v550_v59, 0 }
 0x14c   :  { %v382_v13 = vsel %vm339_vm3, 0.0, %v373_v10  ;;  %v383_v14 = vsel %vm1547_vm4, 0.0, %v368_v9  ;;  %v587_v10 = vsel %vm209_vm0, %v549_v60, 0 }
 0x14d   :  { %v514_v17 = vmul.f32 %v383_v14, %v1479_v21  ;;  %v513_v19 = vmul.f32 %v382_v13, %v1477_v18 }
 0x14f   :  { %v548_v20 = vpack.c.bf16 %v514_v17, %v514_v17  ;;  %v547_v22 = vpack.c.bf16 %v513_v19, %v513_v19 }
 0x151   :  { %v584_v23 = vsel %vm209_vm0, %v548_v20, 0  ;;  %v581_v27 = vsel %vm209_vm0, %v547_v22, 0 }
 0x152   :  { %v79_v30 = vpop.permute.xlu0 %78  ;;  %626 = vmatpush.bf16.msrb.mxu3 %v584_v23  ;;  %v344_v31 = vpop.permute.xlu1 %343  ;;  %603 = vmatpush.bf16.msrb.mxu2 %v581_v27  ;;  %v516_v23 = vmul.f32 %v1501_v28, %v1591_v38 }
 0x153   :  { %v1602_v50 = vadd.f32 %v1424_v36, %v79_v30  ;;  %v1605_v34 = vadd.f32 %v1426_v37, %v79_v30  ;;  %v385_v27 = vpop.permute.xlu2 %384 }
 0x155   :  { %v518_v20 = vmul.f32 %v1504_v29, %v1605_v34  ;;  %v517_v22 = vmul.f32 %v1484_v24, %v1602_v50 }
 0x156   :  { %604 = vmatpush.bf16.msrb.mxu2 %v541_v0  ;;  %627 = vmatpush.bf16.msrb.mxu3 %v542_v1  ;;  %v1172_v1 = vld [vmem:[%s2165_s3] sm:$0xff] }
 0x157   :  { %v537_v24 = vpack.c.bf16 %v517_v22, %v1444_v56 }
 0x15a   :  { %v354_v41 = vpop.permute.xlu0 %353  ;;  %v356_v43 = vpop.permute.xlu1 %355 }
 0x15b   :  { %v364_v44 = vsel %vm363_vm2, %v344_v31, %v354_v41  ;;  %v369_v46 = vsel %vm363_vm2, %v354_v41, %v344_v31  ;;  %v365_v47 = vsel %vm363_vm2, %v346_v4, %v356_v43  ;;  %v370_v49 = vsel %vm363_vm2, %v356_v43, %v346_v4  ;;  %v1634_v4 = vld [vmem:[%s2167_s5] sm:$0xff] }
 0x15c   :  { %v374_v48 = vsel %vm339_vm3, 0.0, %v369_v46  ;;  %v375_v51 = vsel %vm1547_vm4, 0.0, %v364_v44  ;;  %v376_v54 = vsel %vm339_vm3, 0.0, %v370_v49  ;;  %v377_v55 = vsel %vm1547_vm4, 0.0, %v365_v47 }
 0x15d   :  { %v505_v57 = vmul.f32 %v374_v48, %v1441_v53  ;;  %v506_v36 = vmul.f32 %v375_v51, %v1591_v38  ;;  %v507_v37 = vmul.f32 %v376_v54, %v1602_v50  ;;  %v508_v58 = vmul.f32 %v377_v55, %v1605_v34  ;;  %v397_v51 = vpop.permute.xlu2 %396 }
 0x15f   :  { %v535_v61 = vpack.c.bf16 %v507_v37, %v505_v57  ;;  %v536_v0 = vpack.c.bf16 %v508_v58, %v506_v36  ;;  %v250_v57 = vpop.f32.mrf.mxu0 }
 0x161   :  { %605 = vmatpush.bf16.msrb.mxu2 %v535_v61  ;;  %628 = vmatpush.bf16.msrb.mxu3 %v536_v0 }
 0x162   :  { %v403_v25 = vpop.permute.xlu0 %402  ;;  %v389_v9 = vpop.permute.xlu1 %388 }
 0x163   :  { %v409_v40 = vsel %vm404_vm5, %v393_v52, %v403_v25  ;;  %v414_v42 = vsel %vm404_vm5, %v403_v25, %v393_v52  ;;  %v1692_v52 = vld [vmem:[%s2167_s5 + $0x8] sm:$0xff] }
 0x164   :  { %v423_v13 = vsel %vm341_vm6, 0.0, %v409_v40  ;;  %v424_v14 = vsel %vm1627_vm7, 0.0, %v414_v42  ;;  %1131 = vmatmul.msk.bf16.vlgmr.msrb.gmra.mxu2 %vm184_vm1, %v1634_v4  ;;  %1134 = vmatmul.msk.bf16.vlgmr.msrb.gmra.mxu3 %vm184_vm1, %v1634_v4 }
 0x165   :  { %672 = vmatpush.bf16.msra.mxu3 %v590_v6  ;;  %649 = vmatpush.bf16.msra.mxu2 %v587_v10  ;;  %v533_v17 = vmul.f32 %v423_v13, %v1477_v18  ;;  %v534_v19 = vmul.f32 %v424_v14, %v1479_v21  ;;  %v538_v21 = vpack.c.bf16 %v518_v20, %v516_v23 }
 0x167   :  { %v551_v30 = vpack.c.bf16 %v533_v17, %v533_v17  ;;  %v552_v18 = vpack.c.bf16 %v534_v19, %v534_v19  ;;  %v252_v10 = vpop.f32.mrf.mxu0 }
 0x169   :  { %650 = vmatpush.bf16.msra.mxu2 %v543_v15  ;;  %673 = vmatpush.bf16.msra.mxu3 %v544_v16  ;;  %v596_v29 = vsel %vm209_vm0, %v552_v18, 0  ;;  %v593_v28 = vsel %vm209_vm0, %v551_v30, 0  ;;  %v139_v30 = vpop.permute.xlu2 %138 }
 0x16a   :  { %v399_v31 = vpop.permute.xlu0 %398  ;;  %v401_v41 = vpop.permute.xlu1 %400 }
 0x16b   :  { %v407_v43 = vsel %vm404_vm5, %v389_v9, %v399_v31  ;;  %v412_v2 = vsel %vm404_vm5, %v399_v31, %v389_v9  ;;  %v408_v3 = vsel %vm404_vm5, %v1583_v32, %v401_v41  ;;  %v413_v11 = vsel %vm404_vm5, %v401_v41, %v1583_v32 }
 0x16c   :  { %v419_v56 = vsel %vm341_vm6, 0.0, %v407_v43  ;;  %v420_v12 = vsel %vm1627_vm7, 0.0, %v412_v2  ;;  %v421_v15 = vsel %vm341_vm6, 0.0, %v408_v3  ;;  %v422_v16 = vsel %vm1627_vm7, 0.0, %v413_v11  ;;  %v948_v43 = vld [vmem:[%s2166_s4 + $0x8] sm:$0xff]  ;;  %v950_v2 = vld [vmem:[%s2166_s4 + $0x18] sm:$0xff] }
 0x16d   :  { %674 = vmatpush.bf16.msra.mxu3 %v538_v21  ;;  %651 = vmatpush.bf16.msra.mxu2 %v537_v24  ;;  %v529_v44 = vmul.f32 %v419_v56, %v1446_v62  ;;  %v530_v46 = vmul.f32 %v420_v12, %v1448_v63  ;;  %v531_v32 = vmul.f32 %v421_v15, %v1458_v7  ;;  %v947_v24 = vld [vmem:[%s2166_s4] sm:$0xff] }
 0x16e   :  { %v532_v47 = vmul.f32 %v422_v16, %v1460_v8  ;;  %v951_v3 = vld [vmem:[%s2166_s4 + $0x20] sm:$0xff] }
 0x16f   :  { %v545_v49 = vpack.c.bf16 %v531_v32, %v529_v44  ;;  %v255_v17 = vpop.f32.mrf.mxu0 }
 0x170   :  { %v546_v48 = vpack.c.bf16 %v532_v47, %v530_v46 }
 0x171   :  { %718 = vmatpush.bf16.msrb.mxu3 %v596_v29  ;;  %695 = vmatpush.bf16.msrb.mxu2 %v593_v28  ;;  %v949_v28 = vld [vmem:[%s2166_s4 + $0x10] sm:$0xff] }
 0x172   :  { %v387_v54 = vpop.permute.xlu0 %386  ;;  %v395_v55 = vpop.permute.xlu1 %394 }
 0x173   :  { %v406_v62 = vsel %vm404_vm5, %v387_v54, %v397_v51  ;;  %v411_v63 = vsel %vm404_vm5, %v397_v51, %v387_v54  ;;  %v405_v7 = vsel %vm404_vm5, %v385_v27, %v395_v55  ;;  %v410_v8 = vsel %vm404_vm5, %v395_v55, %v385_v27 }
 0x174   :  { %v417_v36 = vsel %vm341_vm6, 0.0, %v406_v62  ;;  %v418_v37 = vsel %vm1627_vm7, 0.0, %v411_v63  ;;  %v415_v58 = vsel %vm341_vm6, 0.0, %v405_v7  ;;  %v416_v59 = vsel %vm1627_vm7, 0.0, %v410_v8  ;;  %1132 = vmatmul.msk.bf16.gmra.mxu2 %vm184_vm1, %v1692_v52  ;;  %1135 = vmatmul.msk.bf16.gmra.mxu3 %vm184_vm1, %v1692_v52 }
 0x175   :  { %696 = vmatpush.bf16.msrb.mxu2 %v545_v49  ;;  %719 = vmatpush.bf16.msrb.mxu3 %v546_v48  ;;  %v527_v60 = vmul.f32 %v417_v36, %v1602_v50  ;;  %v528_v61 = vmul.f32 %v418_v37, %v1605_v34  ;;  %v525_v0 = vmul.f32 %v415_v58, %v1441_v53  ;;  %v557_v50 = vld [vmem:[%s2167_s5 + $0x10] sm:$0xf] }
 0x176   :  { %v526_v26 = vmul.f32 %v416_v59, %v1591_v38  ;;  %v298_v38 = vpop.f32.mrf.mxu1  ;;  %v567_v9 = vunpack.c.l.b16 %v557_v50 }
 0x177   :  { %v539_v5 = vpack.c.bf16 %v527_v60, %v525_v0  ;;  %v257_v27 = vpop.f32.mrf.mxu0 }
 0x178   :  { %v540_v25 = vpack.c.bf16 %v528_v61, %v526_v26  ;;  %v570_v42 = vpack.c.b16 %v567_v9, %v567_v9  ;;  %v1757_v21 = vadd.f32 %v257_v27, %v139_v30 }
 0x179   :  { %697 = vmatpush.bf16.msrb.mxu2 %v539_v5 }
 0x17a   :  { %720 = vmatpush.bf16.msrb.mxu3 %v540_v25  ;;  %v144_v6 = vpop.permute.xlu0 %143  ;;  %v134_v40 = vpop.permute.xlu1 %133 }
 0x17b   :  { %v1722_v34 = vadd.f32 %v1585_v33, %v144_v6  ;;  %v1725_v53 = vadd.f32 %v1587_v35, %v144_v6  ;;  %v1747_v22 = vadd.f32 %v255_v17, %v134_v40 }
 0x17d   :  { %2177 = vst [vmem:[#allocation5_spill] sm:$0xff] %v1722_v34  ;;  %443 = vrot.lane.b32.xlu0 %v1725_v53, %s1296_s24  ;;  %433 = vrot.lane.b32.xlu2 %v1722_v34, %s1296_s24 }
 0x17e   :  { %2178 = vst [vmem:[#allocation6_spill] sm:$0xff] %v1725_v53  ;;  %473 = vrot.lane.b32.xlu1 %v1722_v34, %s1297_s27  ;;  %v300_v35 = vpop.f32.mrf.mxu1 }
 0x182   :  { %v124_v13 = vpop.permute.xlu0 %123  ;;  %v129_v19 = vpop.permute.xlu1 %128 }
 0x183   :  { %v1733_v33 = vadd.f32 %v250_v57, %v124_v13  ;;  %v1735_v14 = vadd.f32 %v298_v38, %v124_v13  ;;  %v1745_v20 = vadd.f32 %v252_v10, %v129_v19  ;;  %v1755_v18 = vadd.f32 %v300_v35, %v129_v19 }
 0x184   :  { %1133 = vmatmul.msk.bf16.gmra.mxu2 %vm184_vm1, %v570_v42  ;;  %1136 = vmatmul.msk.bf16.gmra.mxu3 %vm184_vm1, %v570_v42 }
 0x185   :  { %465 = vrot.lane.b32.xlu0 %v1733_v33, %s1297_s27  ;;  %483 = vrot.lane.b32.xlu2 %v1725_v53, %s1297_s27 }
 0x186   :  { %435 = vrot.lane.b32.xlu1 %v1735_v14, %s1296_s24  ;;  %v303_v23 = vpop.f32.mrf.mxu1 }
 0x187   :  { %v1769_v31 = vadd.f32 %v303_v23, %v134_v40 }
 0x18d   :  { %427 = vrot.lane.b32.xlu0 %v1745_v20, %s1296_s24  ;;  %425 = vrot.lane.b32.xlu2 %v1733_v33, %s1296_s24 }
 0x18e   :  { %469 = vrot.lane.b32.xlu1 %v1747_v22, %s1297_s27  ;;  %v305_v29 = vpop.f32.mrf.mxu1 }
 0x18f   :  { %v1771_v41 = vadd.f32 %v305_v29, %v139_v30 }
 0x194   :  { %1137 = vmatmul.msk.bf16.vlgmr.msra.gmra.mxu2 %vm184_vm1, %v1634_v4  ;;  %1140 = vmatmul.msk.bf16.vlgmr.msra.gmra.mxu3 %vm184_vm1, %v1634_v4 }
 0x195   :  { %429 = vrot.lane.b32.xlu0 %v1747_v22, %s1296_s24  ;;  %437 = vrot.lane.b32.xlu2 %v1755_v18, %s1296_s24 }
 0x196   :  { %431 = vrot.lane.b32.xlu1 %v1757_v21, %s1296_s24 }
 0x19d   :  { %479 = vrot.lane.b32.xlu0 %v1769_v31, %s1297_s27  ;;  %439 = vrot.lane.b32.xlu2 %v1769_v31, %s1296_s24 }
 0x19e   :  { %481 = vrot.lane.b32.xlu1 %v1771_v41, %s1297_s27 }
 0x1a4   :  { %1138 = vmatmul.msk.bf16.gmra.mxu2 %vm184_vm1, %v1692_v52  ;;  %1141 = vmatmul.msk.bf16.gmra.mxu3 %vm184_vm1, %v1692_v52 }
 0x1a5   :  { %441 = vrot.lane.b32.xlu0 %v1771_v41, %s1296_s24  ;;  %471 = vrot.lane.b32.xlu2 %v1757_v21, %s1297_s27 }
 0x1a6   :  { %467 = vrot.lane.b32.xlu1 %v1745_v20, %s1297_s27 }
 0x1ad   :  { %477 = vrot.lane.b32.xlu0 %v1755_v18, %s1297_s27  ;;  %475 = vrot.lane.b32.xlu2 %v1735_v14, %s1297_s27 }
 0x1ae   :  { %954 = vperm.xlu1 %1187, %v947_v24  }
 0x1b4   :  { %1139 = vmatmul.msk.bf16.gmra.mxu2 %vm184_vm1, %v570_v42  ;;  %1142 = vmatmul.msk.bf16.gmra.mxu3 %vm184_vm1, %v570_v42 }
 0x1b5   :  { %964 = vperm.xlu0 %1186, %v949_v28   ;;  %959 = vperm.xlu2 %1188, %v948_v43  }
 0x1b6   :  { %969 = vperm.xlu1 %1187, %v950_v2  }
 0x1bd   :  { %974 = vperm.xlu2 %1188, %v951_v3  }
 0x1c4   :  { %1143 = vmatmul.msk.bf16.vlgmr.msrb.gmra.mxu2 %vm184_vm1, %v1634_v4  ;;  %1146 = vmatmul.msk.bf16.vlgmr.msrb.gmra.mxu3 %vm184_vm1, %v1634_v4 }
 0x1d4   :  { %1144 = vmatmul.msk.bf16.gmra.mxu2 %vm184_vm1, %v1692_v52  ;;  %1147 = vmatmul.msk.bf16.gmra.mxu3 %vm184_vm1, %v1692_v52 }
 0x1d7   :  { %v434_v32 = vpop.permute.xlu2 %433 }
 0x1df   :  { %v1840_v51 = vpop.permute.xlu2 %483 }
 0x1e4   :  { %1145 = vmatmul.msk.bf16.gmra.mxu2 %vm184_vm1, %v570_v42  ;;  %1148 = vmatmul.msk.bf16.gmra.mxu3 %vm184_vm1, %v570_v42 }
 0x1e7   :  { %v1820_v11 = vpop.f32.mrf.mxu2  ;;  %v1822_v56 = vpop.f32.mrf.mxu3 }
 0x1e8   :  { %v426_v63 = vpop.permute.xlu2 %425 }
 0x1ef   :  { %v1824_v12 = vpop.f32.mrf.mxu3  ;;  %v1826_v15 = vpop.f32.mrf.mxu2 }
 0x1f0   :  { %v444_v54 = vpop.permute.xlu0 %443  ;;  %v1846_v8 = vpop.permute.xlu1 %473 }
 0x1f1   :  { %v438_v37 = vpop.permute.xlu2 %437  ;;  %v1866_v35 = vsel %vm363_vm2, %v434_v32, %v444_v54  ;;  %v454_v17 = vsel %vm363_vm2, %v444_v54, %v434_v32  ;;  %v489_v19 = vsel %vm404_vm5, %v1846_v8, %v1840_v51 }
 0x1f2   :  { %2179 = vst [vmem:[#allocation7_spill] sm:$0xff] %v1866_v35  ;;  %v1882_v24 = vsel %vm339_vm3, 0.0, %v454_v17  ;;  %v1891_v2 = vsel %vm341_vm6, 0.0, %v489_v19 }
 0x1f3   :  { %2180 = vst [vmem:[#allocation8_spill] sm:$0xff] %v1891_v2 }
 0x1f7   :  { %v1828_v16 = vpop.f32.mrf.mxu3  ;;  %v1830_v4 = vpop.f32.mrf.mxu2 }
 0x1f8   :  { %v466_v7 = vpop.permute.xlu0 %465  ;;  %v436_v59 = vpop.permute.xlu1 %435 }
 0x1f9   :  { %v440_v0 = vpop.permute.xlu2 %439  ;;  %v450_v23 = vsel %vm363_vm2, %v436_v59, %v426_v63  ;;  %v1878_v27 = vsel %vm363_vm2, %v426_v63, %v436_v59 }
 0x1fa   :  { %v1895_v3 = vsel %vm339_vm3, 0.0, %v450_v23 }
 0x1ff   :  { %v1832_v44 = vpop.f32.mrf.mxu3  ;;  %v1834_v46 = vpop.f32.mrf.mxu2 }
 0x200   :  { %v428_v58 = vpop.permute.xlu0 %427  ;;  %v470_v6 = vpop.permute.xlu1 %469 }
 0x201   :  { %v472_v9 = vpop.permute.xlu2 %471  ;;  %v451_v43 = vsel %vm363_vm2, %v438_v37, %v428_v58  ;;  %v1899_v32 = vsel %vm363_vm2, %v428_v58, %v438_v37 }
 0x202   :  { %v1916_v37 = vsel %vm339_vm3, 0.0, %v451_v43 }
 0x207   :  { %v1836_v47 = vpop.f32.mrf.mxu3  ;;  %v1838_v49 = vpop.f32.mrf.mxu2 }
 0x208   :  { %v430_v26 = vpop.permute.xlu0 %429  ;;  %v432_v40 = vpop.permute.xlu1 %431 }
 0x209   :  { %v476_v30 = vpop.permute.xlu2 %475  ;;  %v1910_v59 = vsel %vm363_vm2, %v430_v26, %v440_v0 }
 0x20a   :  { %v485_v63 = vsel %vm404_vm5, %v466_v7, %v476_v30  ;;  %v1920_v58 = vsel %vm404_vm5, %v476_v30, %v466_v7 }
 0x20b   :  { %2181 = vst [vmem:[#allocation9_spill] sm:$0xff] %v1920_v58  ;;  %v1939_v43 = vsel %vm341_vm6, 0.0, %v485_v63 }
 0x20f   :  { %v642_v48 = vpop.f32.mrf.mxu3  ;;  %v619_v52 = vpop.f32.mrf.mxu2 }
 0x210   :  { %v480_v10 = vpop.permute.xlu0 %479  ;;  %v452_v48 = vsel %vm363_vm2, %v440_v0, %v430_v26  ;;  %v482_v52 = vpop.permute.xlu1 %481 }
 0x211   :  { %v1931_v26 = vsel %vm339_vm3, 0.0, %v452_v48  ;;  %v1935_v23 = vsel %vm404_vm5, %v480_v10, %v470_v6  ;;  %v488_v0 = vsel %vm404_vm5, %v472_v9, %v482_v52  ;;  %v1962_v48 = vsel %vm404_vm5, %v482_v52, %v472_v9 }
 0x212   :  { %v2193_v45 = vld [vmem:[#allocation9_spill] sm:$0xff] }
 0x217   :  { %v1842_v55 = vpop.f32.mrf.mxu3  ;;  %v1844_v62 = vpop.f32.mrf.mxu2 }
 0x218   :  { %v442_v29 = vpop.permute.xlu0 %441  ;;  %v736_v17 = vmax.f32 %v1820_v11, %v1844_v62 }
 0x219   :  { %v1977_v52 = vsel %vm363_vm2, %v432_v40, %v442_v29 }
 0x21f   :  { %v1848_v57 = vpop.f32.mrf.mxu3  ;;  %v1850_v36 = vpop.f32.mrf.mxu2 }
 0x227   :  { %v1852_v60 = vpop.f32.mrf.mxu3  ;;  %v1854_v61 = vpop.f32.mrf.mxu2 }
 0x22f   :  { %v1856_v5 = vpop.f32.mrf.mxu3  ;;  %v1858_v25 = vpop.f32.mrf.mxu2 }
 0x230   :  { %v743_v39 = vmax.f32 %v1832_v44, %v1856_v5 }
 0x237   :  { %v1860_v50 = vpop.f32.mrf.mxu3  ;;  %v1862_v38 = vpop.f32.mrf.mxu2 }
 0x23f   :  { %v688_v42 = vpop.f32.mrf.mxu3  ;;  %v665_v13 = vpop.f32.mrf.mxu2 }
 0x240   :  { %v737_v42 = vmax.f32 %v1822_v56, %v1842_v55  ;;  %v487_v13 = vsel %vm404_vm5, %v470_v6, %v480_v10 }
 0x241   :  { %v1951_v6 = vsel %vm341_vm6, 0.0, %v487_v13  ;;  %v1966_v13 = vsel %vm341_vm6, 0.0, %v488_v0 }
 0x247   :  { %v722_v19 = vpop.f32.mrf.mxu3  ;;  %v699_v7 = vpop.f32.mrf.mxu2 }
 0x248   :  { %v747_v30 = vmax.f32 %v737_v42, %v722_v19  ;;  %v746_v54 = vmax.f32 %v736_v17, %v699_v7 }
 0x24a   :  { %v757_v10 = vsub.f32 %v1822_v56, %v747_v30  ;;  %v787_v63 = vsub.f32 %v1842_v55, %v747_v30  ;;  %v756_v28 = vsub.f32 %v1820_v11, %v746_v54  ;;  %v786_v17 = vsub.f32 %v1844_v62, %v746_v54  ;;  %v478_v55 = vpop.permute.xlu0 %477 }
 0x24b   :  { %v816_v2 = vsub.f32 %v699_v7, %v746_v54  ;;  %v817_v58 = vsub.f32 %v722_v19, %v747_v30  ;;  %v453_v11 = vsel %vm363_vm2, %v442_v29, %v432_v40  ;;  %v739_v62 = vmax.f32 %v1824_v12, %v1848_v57  ;;  %v468_v19 = vpop.permute.xlu1 %467 }
 0x24c   :  { %v768_v56 = vmul.f32 1.442695, %v757_v10  ;;  %v766_v53 = vmul.f32 1.442695, %v756_v28  ;;  %v796_v35 = vmul.f32 1.442695, %v786_v17  ;;  %v738_v28 = vmax.f32 %v1826_v15, %v1850_v36 }
 0x24d   :  { %v826_v34 = vmul.f32 1.442695, %v816_v2  ;;  %v798_v54 = vmul.f32 1.442695, %v787_v63  ;;  %v486_v0 = vsel %vm404_vm5, %v468_v19, %v478_v55  ;;  %v828_v7 = vmul.f32 1.442695, %v817_v58 }
 0x24e   :  { %1189 = vpow2.f32 %v768_v56  ;;  %v1985_v63 = vsel %vm339_vm3, 0.0, %v453_v11  ;;  %v1989_v40 = vsel %vm404_vm5, %v478_v55, %v468_v19  ;;  %v1998_v17 = vsel %vm341_vm6, 0.0, %v486_v0 }
 0x24f   :  { %1191 = vpow2.f32 %v766_v53  ;;  %v724_v2 = vpop.f32.mrf.mxu3  ;;  %v701_v30 = vpop.f32.mrf.mxu2 }
 0x250   :  { %1193 = vpow2.f32 %v796_v35  ;;  %v749_v10 = vmax.f32 %v739_v62, %v724_v2  ;;  %v748_v29 = vmax.f32 %v738_v28, %v701_v30 }
 0x251   :  { %1195 = vpow2.f32 %v826_v34 }
 0x252   :  { %1197 = vpow2.f32 %v798_v54  ;;  %v759_v35 = vsub.f32 %v1824_v12, %v749_v10  ;;  %v789_v58 = vsub.f32 %v1848_v57, %v749_v10  ;;  %v758_v56 = vsub.f32 %v1826_v15, %v748_v29 }
 0x253   :  { %v788_v55 = vsub.f32 %v1850_v36, %v748_v29  ;;  %v818_v11 = vsub.f32 %v701_v30, %v748_v29  ;;  %1199 = vpow2.f32 %v828_v7  ;;  %v819_v19 = vsub.f32 %v724_v2, %v749_v10 }
 0x254   :  { %v1190_v34 = vpop.eup %1189  ;;  %v772_v54 = vmul.f32 1.442695, %v759_v35  ;;  %v2009_v57 = vsel %vm404_vm5, %v1840_v51, %v1846_v8  ;;  %v770_v28 = vmul.f32 1.442695, %v758_v56  ;;  %v741_v30 = vmax.f32 %v1828_v16, %v1852_v60 }
 0x255   :  { %v1192_v12 = vpop.eup %1191  ;;  %2182 = vst [vmem:[#allocation10_spill] sm:$0xff] %v2009_v57  ;;  %v800_v15 = vmul.f32 1.442695, %v788_v55  ;;  %v830_v0 = vmul.f32 1.442695, %v818_v11  ;;  %v740_v29 = vmax.f32 %v1830_v4, %v1854_v61  ;;  %v742_v10 = vmax.f32 %v1834_v46, %v1858_v25 }
 0x256   :  { %v1194_v36 = vpop.eup %1193  ;;  %1201 = vpow2.f32 %v772_v54  ;;  %v802_v7 = vmul.f32 1.442695, %v789_v58  ;;  %v832_v56 = vmul.f32 1.442695, %v819_v19  ;;  %v876_v62 = vmul.f32 %v1192_v12, %v1895_v3 }
 0x257   :  { %v1196_v2 = vpop.eup %1195  ;;  %v846_v51 = vadd.f32 %v1194_v36, %v1192_v12  ;;  %1203 = vpow2.f32 %v770_v28  ;;  %v727_v8 = vpop.f32.mrf.mxu3  ;;  %v886_v57 = vmul.f32 %v1194_v36, %v1733_v33 }
 0x258   :  { %v2019_v35 = vpop.eup %1197  ;;  %1205 = vpow2.f32 %v800_v15  ;;  %v704_v55 = vpop.f32.mrf.mxu2  ;;  %v751_v11 = vmax.f32 %v741_v30, %v727_v8 }
 0x259   :  { %v856_v54 = vadd.f32 %v1196_v2, %v846_v51  ;;  %v847_v58 = vadd.f32 %v2019_v35, %v1190_v34  ;;  %1207 = vpow2.f32 %v830_v0  ;;  %v750_v9 = vmax.f32 %v740_v29, %v704_v55  ;;  %v2023_v42 = vpop.eup %1199 }
 0x25a   :  { %1209 = vpow2.f32 %v802_v7  ;;  %v761_v53 = vsub.f32 %v1828_v16, %v751_v11  ;;  %v791_v28 = vsub.f32 %v1852_v60, %v751_v11  ;;  %v821_v29 = vsub.f32 %v727_v8, %v751_v11 }
 0x25b   :  { %1211 = vrcp.f32 %v856_v54  ;;  %v857_v19 = vadd.f32 %v2023_v42, %v847_v58  ;;  %v760_v15 = vsub.f32 %v1830_v4, %v750_v9  ;;  %v790_v3 = vsub.f32 %v1854_v61, %v750_v9 }
 0x25c   :  { %v2031_v12 = vpop.eup %1201  ;;  %1213 = vpow2.f32 %v832_v56  ;;  %v820_v0 = vsub.f32 %v704_v55, %v750_v9  ;;  %v776_v30 = vmul.f32 1.442695, %v761_v53  ;;  %v745_v16 = vmax.f32 %v1836_v47, %v1860_v50 }
 0x25d   :  { %v1204_v7 = vpop.eup %1203  ;;  %1215 = vrcp.f32 %v857_v19  ;;  %v774_v60 = vmul.f32 1.442695, %v760_v15  ;;  %v804_v33 = vmul.f32 1.442695, %v790_v3  ;;  %v744_v51 = vmax.f32 %v1838_v49, %v1862_v38 }
 0x25e   :  { %v1206_v36 = vpop.eup %1205  ;;  %v834_v4 = vmul.f32 1.442695, %v820_v0  ;;  %1217 = vpow2.f32 %v776_v30  ;;  %v806_v61 = vmul.f32 1.442695, %v791_v28  ;;  %v906_v53 = vmul.f32 %v1196_v2, %v1939_v43 }
 0x25f   :  { %v1208_v54 = vpop.eup %1207  ;;  %v848_v58 = vadd.f32 %v1206_v36, %v1204_v7  ;;  %1219 = vpow2.f32 %v774_v60  ;;  %v729_v9 = vpop.f32.mrf.mxu3  ;;  %v2183_v8 = vsel %vm1547_vm4, 0.0, %v1878_v27  ;;  %v836_v11 = vmul.f32 1.442695, %v821_v29 }
 0x260   :  { %v2042_v56 = vmul.f32 %v1190_v34, %v2183_v8  ;;  %v2044_v55 = vpop.eup %1209  ;;  %1221 = vpow2.f32 %v804_v33  ;;  %v706_v19 = vpop.f32.mrf.mxu2  ;;  %v753_v15 = vmax.f32 %v743_v39, %v729_v9  ;;  %v896_v3 = vadd.f32 %v886_v57, %v876_v62 }
 0x261   :  { %v2046_v28 = vpop.eup %1211  ;;  %v858_v0 = vadd.f32 %v1208_v54, %v848_v58  ;;  %v849_v30 = vadd.f32 %v2044_v55, %v2031_v12  ;;  %1223 = vpow2.f32 %v834_v4  ;;  %v752_v43 = vmax.f32 %v742_v10, %v706_v19 }
 0x262   :  { %v2050_v2 = vpop.eup %1213  ;;  %1225 = vpow2.f32 %v806_v61  ;;  %v763_v27 = vsub.f32 %v1832_v44, %v753_v15  ;;  %v793_v34 = vsub.f32 %v1856_v5, %v753_v15  ;;  %v823_v60 = vsub.f32 %v729_v9, %v753_v15 }
 0x263   :  { %v2054_v29 = vpop.eup %1215  ;;  %1227 = vrcp.f32 %v858_v0  ;;  %v859_v62 = vadd.f32 %v2050_v2, %v849_v30  ;;  %v762_v57 = vsub.f32 %v1834_v46, %v752_v43  ;;  %v792_v39 = vsub.f32 %v1858_v25, %v752_v43 }
 0x264   :  { %v1218_v33 = vpop.eup %1217  ;;  %1229 = vpow2.f32 %v836_v11  ;;  %v822_v10 = vsub.f32 %v706_v19, %v752_v43  ;;  %v780_v4 = vmul.f32 1.442695, %v763_v27  ;;  %v878_v61 = vmul.f32 %v1204_v7, %v1916_v37 }
 0x265   :  { %v1220_v58 = vpop.eup %1219  ;;  %1231 = vrcp.f32 %v859_v62  ;;  %v778_v44 = vmul.f32 1.442695, %v762_v57  ;;  %v808_v5 = vmul.f32 1.442695, %v792_v39  ;;  %v888_v9 = vmul.f32 %v1206_v36, %v1745_v20 }
 0x266   :  { %v1222_v8 = vpop.eup %1221  ;;  %v838_v15 = vmul.f32 1.442695, %v822_v10  ;;  %1233 = vpow2.f32 %v780_v4  ;;  %v810_v0 = vmul.f32 1.442695, %v793_v34  ;;  %v2062_v46 = vmul.f32 %v1208_v54, %v1998_v17 }
 0x267   :  { %v1224_v25 = vpop.eup %1223  ;;  %v850_v30 = vadd.f32 %v1222_v8, %v1220_v58  ;;  %1235 = vpow2.f32 %v778_v44  ;;  %v840_v11 = vmul.f32 1.442695, %v823_v60  ;;  %v732_v19 = vpop.f32.mrf.mxu3  ;;  %v916_v43 = vadd.f32 %v906_v53, %v896_v3 }
 0x268   :  { %v1226_v37 = vpop.eup %1225  ;;  %1237 = vpow2.f32 %v808_v5  ;;  %v709_v7 = vpop.f32.mrf.mxu2  ;;  %v755_v27 = vmax.f32 %v745_v16, %v732_v19  ;;  %v880_v62 = vmul.f32 %v1220_v58, %v1931_v26  ;;  %v2184_v20 = vsel %vm1547_vm4, 0.0, %v1910_v59 }
 0x269   :  { %v2069_v36 = vmul.f32 %v1218_v33, %v2184_v20  ;;  %v2071_v17 = vpop.eup %1227  ;;  %v860_v54 = vadd.f32 %v1224_v25, %v850_v30  ;;  %v851_v34 = vadd.f32 %v1226_v37, %v1218_v33  ;;  %1239 = vpow2.f32 %v838_v15 }
 0x26a   :  { %v754_v60 = vmax.f32 %v744_v51, %v709_v7  ;;  %v2073_v57 = vpop.eup %1229  ;;  %1241 = vpow2.f32 %v810_v0  ;;  %v765_v53 = vsub.f32 %v1836_v47, %v755_v27  ;;  %v795_v16 = vsub.f32 %v1860_v50, %v755_v27 }
 0x26b   :  { %v890_v26 = vmul.f32 %v1222_v8, %v1747_v22  ;;  %v2078_v3 = vpop.eup %1231  ;;  %1243 = vrcp.f32 %v860_v54  ;;  %v861_v59 = vadd.f32 %v2073_v57, %v851_v34  ;;  %v825_v58 = vsub.f32 %v732_v19, %v755_v27 }
 0x26c   :  { %v764_v39 = vsub.f32 %v1838_v49, %v754_v60  ;;  %v794_v33 = vsub.f32 %v1862_v38, %v754_v60  ;;  %v1234_v10 = vpop.eup %1233  ;;  %1245 = vpow2.f32 %v840_v11  ;;  %v824_v51 = vsub.f32 %v709_v7, %v754_v60 }
 0x26d   :  { %v784_v4 = vmul.f32 1.442695, %v765_v53  ;;  %v1236_v44 = vpop.eup %1235  ;;  %1247 = vrcp.f32 %v861_v59  ;;  %v814_v5 = vmul.f32 1.442695, %v795_v16  ;;  %v900_v0 = vadd.f32 %v890_v26, %v880_v62 }
 0x26e   :  { %v782_v47 = vmul.f32 1.442695, %v764_v39  ;;  %v812_v50 = vmul.f32 1.442695, %v794_v33  ;;  %v1238_v22 = vpop.eup %1237  ;;  %v842_v8 = vmul.f32 1.442695, %v824_v51  ;;  %v882_v15 = vmul.f32 %v1236_v44, %v1985_v63 }
 0x26f   :  { %1249 = vpow2.f32 %v784_v4  ;;  %v1240_v30 = vpop.eup %1239  ;;  %v852_v49 = vadd.f32 %v1238_v22, %v1236_v44  ;;  %v734_v38 = vpop.f32.mrf.mxu3  ;;  %v892_v11 = vmul.f32 %v1238_v22, %v1757_v21  ;;  %v898_v7 = vadd.f32 %v888_v9, %v878_v61 }
 0x270   :  { %1251 = vpow2.f32 %v782_v47  ;;  %v1242_v20 = vpop.eup %1241  ;;  %v844_v19 = vmul.f32 1.442695, %v825_v58  ;;  %v711_v27 = vpop.f32.mrf.mxu2  ;;  %v910_v54 = vmul.f32 %v1224_v25, %v1951_v6  ;;  %v2185_v34 = vsel %vm1547_vm4, 0.0, %v1977_v52 }
 0x271   :  { %1253 = vpow2.f32 %v812_v50  ;;  %v883_v60 = vmul.f32 %v1234_v10, %v2185_v34  ;;  %v1244_v63 = vpop.eup %1243  ;;  %v862_v62 = vadd.f32 %v1240_v30, %v852_v49  ;;  %v853_v53 = vadd.f32 %v1242_v20, %v1234_v10  ;;  %v2188_v50 = vld [vmem:[#allocation5_spill] sm:$0xff] }
 0x272   :  { %1255 = vpow2.f32 %v842_v8  ;;  %v891_v16 = vmul.f32 %v1226_v37, %v1769_v31  ;;  %v1246_v26 = vpop.eup %1245  ;;  %v902_v21 = vadd.f32 %v892_v11, %v882_v15  ;;  %v920_v61 = vadd.f32 %v910_v54, %v900_v0  ;;  %v2192_v11 = vld [vmem:[#allocation6_spill] sm:$0xff] }
 0x273   :  { %1257 = vpow2.f32 %v814_v5  ;;  %v893_v9 = vmul.f32 %v1242_v20, %v1771_v41  ;;  %v1248_v59 = vpop.eup %1247  ;;  %v863_v6 = vadd.f32 %v1246_v26, %v853_v53  ;;  %v2093_v25 = vmul.f32 %v2046_v28, %v916_v43 }
 0x274   :  { %1259 = vrcp.f32 %v862_v62  ;;  %v2186_v52 = vsel %vm1547_vm4, 0.0, %v1899_v32  ;;  %v912_v31 = vmul.f32 %v1240_v30, %v1966_v13  ;;  %v930_v37 = vmul.f32 %v1244_v63, %v920_v61 }
 0x275   :  { %v879_v39 = vmul.f32 %v2031_v12, %v2186_v52  ;;  %v1250_v33 = vpop.eup %1249  ;;  %1261 = vpow2.f32 %v844_v19  ;;  %v918_v10 = vadd.f32 %v2062_v46, %v898_v7  ;;  %v901_v51 = vadd.f32 %v891_v16, %v2069_v36 }
 0x276   :  { %v1252_v41 = vpop.eup %1251  ;;  %1263 = vrcp.f32 %v863_v6  ;;  %v903_v4 = vadd.f32 %v893_v9, %v883_v60  ;;  %v887_v28 = vmul.f32 %v2019_v35, %v1735_v14  ;;  %v922_v58 = vadd.f32 %v912_v31, %v902_v21  ;;  %v2196_v21 = vld [vmem:[#allocation8_spill] sm:$0xff] }
 0x277   :  { %v1254_v43 = vpop.eup %1253  ;;  %v2187_v32 = vsel %vm1627_vm7, 0.0, %v1935_v23  ;;  %v928_v13 = vmul.f32 %v2071_v17, %v918_v10  ;;  %v889_v46 = vmul.f32 %v2044_v55, %v1755_v18  ;;  %v884_v36 = vmul.f32 %v1252_v41, %v1882_v24  ;;  %v2190_v23 = vld [vmem:[#allocation7_spill] sm:$0xff] }
 0x278   :  { %v911_v12 = vmul.f32 %v2073_v57, %v2187_v32  ;;  %v1256_v44 = vpop.eup %1255  ;;  %v854_v47 = vadd.f32 %v1254_v43, %v1252_v41  ;;  %v894_v5 = vmul.f32 %v1254_v43, %v2188_v50  ;;  %v2189_v14 = vsel %vm1627_vm7, 0.0, %v1962_v48  ;;  %v940_v43 = vld [vmem:[%s2165_s3 + $0x10] sm:$0xf] }
 0x279   :  { %v913_v35 = vmul.f32 %v1246_v26, %v2189_v14  ;;  %v1258_v22 = vpop.eup %1257  ;;  %v2191_v57 = vsel %vm1547_vm4, 0.0, %v2190_v23  ;;  %v941_v8 = vpack.c.bf16 %v928_v13, %v2093_v25  ;;  %v897_v18 = vadd.f32 %v887_v28, %v2042_v56  ;;  %v2197_v25 = vld [vmem:[#allocation10_spill] sm:$0xff] }
 0x27a   :  { %v885_v17 = vmul.f32 %v1250_v33, %v2191_v57  ;;  %v899_v55 = vadd.f32 %v889_v46, %v879_v39  ;;  %v1260_v15 = vpop.eup %1259  ;;  %v864_v24 = vadd.f32 %v1256_v44, %v854_v47  ;;  %v855_v0 = vadd.f32 %v1258_v22, %v1250_v33 }
 0x27b   :  { %v921_v30 = vadd.f32 %v911_v12, %v901_v51  ;;  %v923_v49 = vadd.f32 %v913_v35, %v903_v4  ;;  %v1262_v38 = vpop.eup %1261  ;;  %v895_v48 = vmul.f32 %v1258_v22, %v2192_v11  ;;  %v932_v7 = vmul.f32 %v1260_v15, %v922_v58  ;;  %v955_v12 = vpop.permute.xlu1 %954 }
 0x27c   :  { %v2194_v20 = vsel %vm1627_vm7, 0.0, %v2193_v45  ;;  %v2195_v56 = vsel %vm1627_vm7, 0.0, %v1989_v40  ;;  %v1264_v54 = vpop.eup %1263  ;;  %v865_v34 = vadd.f32 %v1262_v38, %v855_v0  ;;  %1265 = vrcp.f32 %v864_v24  ;;  %v965_v22 = vpop.permute.xlu0 %964 }
 0x27d   :  { %v907_v19 = vmul.f32 %v2023_v42, %v2194_v20  ;;  %v909_v27 = vmul.f32 %v2050_v2, %v2195_v56  ;;  %v904_v60 = vadd.f32 %v894_v5, %v884_v36  ;;  %v931_v63 = vmul.f32 %v1248_v59, %v921_v30  ;;  %v960_v36 = vpop.permute.xlu2 %959 }
 0x27e   :  { %v943_v62 = vpack.c.bf16 %v932_v7, %v930_v37  ;;  %v933_v53 = vmul.f32 %v1264_v54, %v923_v49  ;;  %v914_v61 = vmul.f32 %v1256_v44, %v2196_v21  ;;  %1267 = vrcp.f32 %v865_v34 }
 0x27f   :  { %v917_v16 = vadd.f32 %v907_v19, %v897_v18  ;;  %v919_v26 = vadd.f32 %v909_v27, %v899_v55  ;;  %v905_v9 = vadd.f32 %v895_v48, %v885_v17  ;;  %v504_v2 = vsel %vm1627_vm7, 0.0, %v2197_v25 }
 0x280   :  { %v944_v42 = vpack.c.bf16 %v933_v53, %v931_v63  ;;  %v924_v52 = vadd.f32 %v914_v61, %v904_v60  ;;  %v915_v39 = vmul.f32 %v1262_v38, %v504_v2  ;;  %v986_v58 = vunpack.c.l.b16 %v940_v43 }
 0x281   :  { %v927_v6 = vmul.f32 %v2054_v29, %v917_v16  ;;  %v929_v40 = vmul.f32 %v2078_v3, %v919_v26  ;;  %v1173_v3 = vld [vmem:[%s2165_s3 + $0x8] sm:$0xff]  ;;  %s1298_s3 = smov [#allocation2]  }
 0x282   :  { %v1266_v33 = vpop.eup %1265  ;;  %v925_v37 = vadd.f32 %v915_v39, %v905_v9  ;;  %v989_v32 = vpack.c.b16 %v986_v58, %v986_v58  ;;  %s1065_s7 = sshll.u32 %s1298_s3, 4  ;;  %s1066_s7 = int_to_ptr.vmem [resolvable:$true] %s1065_s7 }
 0x283   :  { %v942_v59 = vpack.c.bf16 %v929_v40, %v927_v6  ;;  %v934_v31 = vmul.f32 %v1266_v33, %v924_v52  ;;  %v970_v18 = vpop.permute.xlu1 %969 }
 0x284   :  { %v1268_v10 = vpop.eup %1267 }
 0x285   :  { %v945_v41 = vpack.c.bf16 %v934_v31, %v934_v31  ;;  %v935_v51 = vmul.f32 %v1268_v10, %v925_v37  ;;  %v975_v30 = vpop.permute.xlu2 %974 }
 0x287   :  { %v1000_v4 = vsel %vm209_vm0, %v945_v41, 0  ;;  %v946_v28 = vpack.c.bf16 %v935_v51, %v935_v51 }
 0x288   :  { %1010 = vmatpush.bf16.msrb.mxu0 %v1000_v4 }
 0x289   :  { %v1003_v29 = vsel %vm209_vm0, %v946_v28, 0 }
 0x28a   :  { %1033 = vmatpush.bf16.msrb.mxu1 %v1003_v29 }
 0x28c   :  { %1011 = vmatpush.bf16.msrb.mxu0 %v943_v62 }
 0x28e   :  { %1034 = vmatpush.bf16.msrb.mxu1 %v944_v42 }
 0x290   :  { %1012 = vmatpush.bf16.msrb.mxu0 %v941_v8 }
 0x292   :  { %1035 = vmatpush.bf16.msrb.mxu1 %v942_v59 }
 0x293   :  { %1157 = vmatmul.msk.bf16.vlgmr.msrb.gmra.mxu0 %vm184_vm1, %v1172_v1 }
 0x295   :  { %1160 = vmatmul.msk.bf16.vlgmr.msrb.gmra.mxu1 %vm184_vm1, %v1172_v1 }
 0x2a3   :  { %1158 = vmatmul.msk.bf16.gmra.mxu0 %vm184_vm1, %v1173_v3 }
 0x2a5   :  { %1161 = vmatmul.msk.bf16.gmra.mxu1 %vm184_vm1, %v1173_v3 }
 0x2b3   :  { %1159 = vmatmul.msk.bf16.gmra.mxu0 %vm184_vm1, %v989_v32 }
 0x2b5   :  { %1162 = vmatmul.msk.bf16.gmra.mxu1 %vm184_vm1, %v989_v32 }
 0x310   :  { %v1014_v13 = vpop.f32.mrf.mxu0 }
 0x311   :  { %v1015_v46 = vadd.f32 %v1014_v13, %v955_v12 }
 0x312   :  { %v1037_v44 = vpop.f32.mrf.mxu1 }
 0x313   :  { %1051 = vst [vmem:[#allocation2] sm:$0xff] %v1015_v46  ;;  %v1038_v47 = vadd.f32 %v1037_v44, %v955_v12 }
 0x315   :  { %1052 = vst [vmem:[#allocation2 + $0x8] sm:$0xff] %v1038_v47 }
 0x318   :  { %v1016_v50 = vpop.f32.mrf.mxu0 }
 0x319   :  { %v1017_v5 = vadd.f32 %v1016_v50, %v960_v36 }
 0x31a   :  { %v1039_v14 = vpop.f32.mrf.mxu1 }
 0x31b   :  { %1053 = vst [vmem:[#allocation2 + $0x10] sm:$0xff] %v1017_v5  ;;  %v1040_v35 = vadd.f32 %v1039_v14, %v960_v36 }
 0x31d   :  { %1054 = vst [vmem:[#allocation2 + $0x18] sm:$0xff] %v1040_v35 }
 0x320   :  { %v1019_v23 = vpop.f32.mrf.mxu0 }
 0x321   :  { %v1020_v57 = vadd.f32 %v1019_v23, %v965_v22 }
 0x322   :  { %v1042_v17 = vpop.f32.mrf.mxu1 }
 0x323   :  { %1055 = vst [vmem:[#allocation2 + $0x20] sm:$0xff] %v1020_v57  ;;  %v1043_v8 = vadd.f32 %v1042_v17, %v965_v22 }
 0x325   :  { %1056 = vst [vmem:[#allocation2 + $0x28] sm:$0xff] %v1043_v8 }
 0x328   :  { %v1021_v55 = vpop.f32.mrf.mxu0 }
 0x329   :  { %v1022_v15 = vadd.f32 %v1021_v55, %v970_v18 }
 0x32a   :  { %v1044_v24 = vpop.f32.mrf.mxu1 }
 0x32b   :  { %1057 = vst [vmem:[#allocation2 + $0x30] sm:$0xff] %v1022_v15  ;;  %v1045_v0 = vadd.f32 %v1044_v24, %v970_v18 }
 0x32d   :  { %1058 = vst [vmem:[#allocation2 + $0x38] sm:$0xff] %v1045_v0 }
 0x330   :  { %v1024_v49 = vpop.f32.mrf.mxu0 }
 0x331   :  { %v1025_v38 = vadd.f32 %v1024_v49, %v975_v30 }
 0x332   :  { %v1047_v11 = vpop.f32.mrf.mxu1 }
 0x333   :  { %1059 = vst [vmem:[#allocation2 + $0x40] sm:$0xff] %v1025_v38  ;;  %v1048_v48 = vadd.f32 %v1047_v11, %v975_v30 }
 0x335   :  { %1060 = vst [vmem:[#allocation2 + $0x48] sm:$0xff] %v1048_v48 }
 0x336   :  { %1073 = dma.vmem_to_hbm [thread:$0]  %s1066_s7, 1280, %s1068_s10, [#allocation3], %s1299_s11, %s1299_s11, %s1300_s12  }
 0x338   :  { %v1026_v7 = vpop.f32.mrf.mxu0 }
 0x33a   :  { %v1049_v45 = vpop.f32.mrf.mxu1 }
 0x33b   :  { %1293 = dma.done.wait [#allocation3], 1280  }
 0x33c   :  { %1294 = vsyncadd [#allocation3], 4294966016 }
 0x33d   :  { %1078 = vsyncpa [#allocation3], 1 }

</bundles_post_ra>
